<compile_context>
chip_gen: v6e
topology: v6e:2x2x1
jax: 0.10.0
libtpu: 0.0.40
codegen_flags: <defaults>
</compile_context>

<pallas_src>
import jax
import jax.numpy as jnp
from jax.experimental import pallas as pl
from jax.experimental.pallas import tpu as pltpu


def _round_up(x, m):
    return (x + m - 1) // m * m


def _choose_m_block(hw):
    """Spatial block size: lane-dense and (when possible) a 256-multiple."""
    for m in (1024, 512, 256, 128):
        if hw % m == 0:
            return m, hw
    m = 128 if hw < 256 else 256
    return m, _round_up(hw, m)


def conv_bn_relu_kernel(p_ref, w_ref, s_ref, b_ref, o_ref):
    """One (batch, spatial-block) tile per grid step.

    p_ref : (Kp, M_BLK)      im2col patches, spatial on lanes          (bf16)
    w_ref : (Cout_m, Kp)     3x3 conv weights, un-scaled               (bf16)
    s_ref : (Cout_m, 1)      BN scale  gamma / sqrt(var + eps)          (f32)
    b_ref : (Cout_m, 1)      shift     beta + (conv_b - mean) * scale   (f32)
    o_ref : (Cout_m, M_BLK)  output block, channels-first, lane-dense   (f32)
    """
    acc = jnp.dot(w_ref[...], p_ref[...],
                  preferred_element_type=jnp.float32)        # (Cout_m, M_BLK)
    # Fused f32 epilogue: BN scale + shift + ReLU, then cast on store.
    o_ref[...] = jnp.maximum(acc * s_ref[...] + b_ref[...], 0.0
                             ).astype(o_ref.dtype)


@jax.jit
def down_forward(x_nchw, weight, conv_bias, gamma, beta,
                 running_mean, running_var, eps=1e-5):
    """Forward pass of `down` (conv3x3 pad1 + BN(eval) + ReLU), NCHW in/out."""
    N, Cin, H, W = x_nchw.shape
    Cout = weight.shape[0]
    HW = H * W
    K = 9 * Cin

    Cout_m = _round_up(Cout, 8)     # sublane multiple only (no 16x writeback)
    Kp = _round_up(K, 16)           # bf16 sublane packing of the contraction dim
    M_BLK, HWp = _choose_m_block(HW)

    # ---- BatchNorm (eval mode): scale applied in the f32 epilogue ----
    scale = gamma / jnp.sqrt(running_var + eps)               # (Cout,)
    shift = beta + (conv_bias - running_mean) * scale         # (Cout,)

    # ---- im2col hoisted out of the kernel as one fused XLA pass ----
    # patches[n, c*9 + dy*3 + dx, h*W + w] = x_pad[n, c, h+dy, w+dx]
    # TODO(synk): for large Cin, build the shifted planes in-kernel with
    # pltpu.roll instead, to avoid the ~9x patches HBM amplification.
    x_pad = jnp.pad(x_nchw, ((0, 0), (0, 0), (1, 1), (1, 1)))
    taps = [x_pad[:, :, dy:dy + H, dx:dx + W]
            for dy in range(3) for dx in range(3)]            # 9 x (N,Cin,H,W)
    patches = jnp.stack(taps, axis=2).reshape(N, K, HW)
    patches = jnp.pad(patches, ((0, 0), (0, Kp - K), (0, HWp - HW))
                      ).astype(jnp.bfloat16)                  # (N, Kp, HWp)

    # (Cout, Cin, 3, 3) -> (Cout_m, Kp), same K ordering as `patches`.
    w2 = jnp.pad(weight.reshape(Cout, K),
                 ((0, Cout_m - Cout), (0, Kp - K))).astype(jnp.bfloat16)
    s2 = jnp.pad(scale, (0, Cout_m - Cout)).reshape(Cout_m, 1).astype(jnp.float32)
    b2 = jnp.pad(shift, (0, Cout_m - Cout)).reshape(Cout_m, 1).astype(jnp.float32)

    n_blocks = HWp // M_BLK

    # Per-block working set -> explicit (generous) VMEM budget.
    block_bytes = (Kp * M_BLK * 2          # patches block (bf16)
                   + Cout_m * M_BLK * 4    # output block  (f32)
                   + Cout_m * Kp * 2       # weights       (bf16)
                   + 2 * 8 * 128 * 4)      # scale / shift tiles
    vmem_limit = int(min(64 << 20,
                         max(16 << 20, 4 * block_bytes + (2 << 20))))

    cost = pl.CostEstimate(
        flops=2 * N * HWp * Kp * Cout_m,
        transcendentals=0,
        bytes_accessed=(N * Kp * HWp * 2 + Cout_m * Kp * 2
                        + 2 * Cout_m * 4 + N * Cout_m * HWp * 4))

    out = pl.pallas_call(
        conv_bn_relu_kernel,
        out_shape=jax.ShapeDtypeStruct((N, Cout_m, HWp), jnp.float32),
        grid_spec=pltpu.PrefetchScalarGridSpec(
            num_scalar_prefetch=0,
            grid=(N, n_blocks),
            in_specs=[
                pl.BlockSpec((None, Kp, M_BLK), lambda n, m: (n, 0, m)),
                pl.BlockSpec((Cout_m, Kp), lambda n, m: (0, 0)),
                pl.BlockSpec((Cout_m, 1), lambda n, m: (0, 0)),
                pl.BlockSpec((Cout_m, 1), lambda n, m: (0, 0)),
            ],
            out_specs=pl.BlockSpec((None, Cout_m, M_BLK), lambda n, m: (n, 0, m)),
        ),
        compiler_params=pltpu.CompilerParams(
            dimension_semantics=("parallel", "parallel"),
            vmem_limit_bytes=vmem_limit),
        cost_estimate=cost,
    )(patches, w2, s2, b2)

    # Result is already channels-first: straight reshape to NCHW, no transpose.
    if Cout_m != Cout or HWp != HW:
        out = out[:, :Cout, :HW]
    # TODO(synk): when chaining layers, keep this (N, C, H*W) layout and emit
    # bf16 from the kernel instead of converting back to NCHW f32 per layer.
    return out.reshape(N, Cout, H, W)


def _reference(x_nchw, weight, conv_bias, gamma, beta,
               running_mean, running_var, eps=1e-5):
    y = jax.lax.conv_general_dilated(
        x_nchw, weight, window_strides=(1, 1), padding=((1, 1), (1, 1)),
        dimension_numbers=("NCHW", "OIHW", "NCHW"))
    y = y + conv_bias[None, :, None, None]
    y = (y - running_mean[None, :, None, None]) / jnp.sqrt(
        running_var + eps)[None, :, None, None]
    y = y * gamma[None, :, None, None] + beta[None, :, None, None]
    return jnp.maximum(y, 0.0)


if __name__ == "__main__":
    key = jax.random.PRNGKey(0)
    N, Cin, Cout, H, W = 2, 4, 8, 16, 16

    k_x, k_w, k_b, k_g, k_be, k_rm, k_rv = jax.random.split(key, 7)
    x = jax.random.normal(k_x, (N, Cin, H, W), jnp.float32)

    # Deterministic synthetic parameters (shapes follow the module __init__).
    weight = jax.random.normal(k_w, (Cout, Cin, 3, 3), jnp.float32) * 0.1
    conv_bias = jax.random.normal(k_b, (Cout,), jnp.float32) * 0.1
    gamma = 1.0 + 0.1 * jax.random.normal(k_g, (Cout,), jnp.float32)
    beta = 0.1 * jax.random.normal(k_be, (Cout,), jnp.float32)
    running_mean = 0.1 * jax.random.normal(k_rm, (Cout,), jnp.float32)
    running_var = 1.0 + 0.1 * jax.random.uniform(k_rv, (Cout,), jnp.float32)

    out = down_forward(x, weight, conv_bias, gamma, beta,
                       running_mean, running_var)
    out = jax.block_until_ready(out)

    ref = _reference(x, weight, conv_bias, gamma, beta,
                     running_mean, running_var)
    assert out.shape == (N, Cout, H, W)
    # Tolerance covers bf16 MXU operands; BN scale is applied in f32, so this
    # is tighter than the previous (3e-2) version.
    assert jnp.allclose(out, ref, rtol=2e-2, atol=2e-2), "mismatch vs reference"

    print("KERNEL_OK")
</pallas_src>

<mosaic_0001>
module attributes {stable_mosaic.version = 11 : i64} {
  func.func @conv_bn_relu_kernel(%arg0: i32, %arg1: i32, %arg2: memref<1x48x256xbf16, #tpu.memory_space<vmem>>, %arg3: memref<8x48xbf16, #tpu.memory_space<vmem>>, %arg4: memref<8x1xf32, #tpu.memory_space<vmem>>, %arg5: memref<8x1xf32, #tpu.memory_space<vmem>>, %arg6: memref<1x8x256xf32, #tpu.memory_space<vmem>>) attributes {dimension_semantics = [#tpu.dimension_semantics<parallel>, #tpu.dimension_semantics<parallel>], iteration_bounds = array<i64: 2, 1>, scalar_prefetch = 0 : i64, scratch_operands = 0 : i64, tpu.core_type = #tpu.core_type<tc>, window_params = [{transform_indices = @transform_0, window_bounds = array<i64: 1, 48, 256>}, {pipeline_mode = #tpu.pipeline_mode<synchronous>, transform_indices = @transform_1, window_bounds = array<i64: 8, 48>}, {pipeline_mode = #tpu.pipeline_mode<synchronous>, transform_indices = @transform_2, window_bounds = array<i64: 8, 1>}, {pipeline_mode = #tpu.pipeline_mode<synchronous>, transform_indices = @transform_3, window_bounds = array<i64: 8, 1>}, {transform_indices = @transform_4, window_bounds = array<i64: 1, 8, 256>}]} {
    %c0 = arith.constant 0 : index
    %c0_0 = arith.constant 0 : index
    %0 = vector.load %arg3[%c0, %c0_0] : memref<8x48xbf16, #tpu.memory_space<vmem>>, vector<8x48xbf16>
    %c0_1 = arith.constant 0 : index
    %c0_2 = arith.constant 0 : index
    %c0_3 = arith.constant 0 : index
    %1 = vector.load %arg2[%c0_1, %c0_2, %c0_3] : memref<1x48x256xbf16, #tpu.memory_space<vmem>>, vector<1x48x256xbf16>
    %2 = vector.shape_cast %1 : vector<1x48x256xbf16> to vector<48x256xbf16>
    %cst = arith.constant dense<0.000000e+00> : vector<8x256xf32>
    %3 = tpu.matmul %0, %2, %cst {dimension_numbers = #tpu.dot_dimension_numbers<[1], [0], [0], [1], [0, 0, 1, 1], [], []>} : vector<8x48xbf16>, vector<48x256xbf16>, vector<8x256xf32> -> vector<8x256xf32>
    %c0_4 = arith.constant 0 : index
    %c0_5 = arith.constant 0 : index
    %4 = vector.load %arg4[%c0_4, %c0_5] : memref<8x1xf32, #tpu.memory_space<vmem>>, vector<8x1xf32>
    %5 = vector.broadcast %4 : vector<8x1xf32> to vector<8x256xf32>
    %6 = arith.mulf %3, %5 : vector<8x256xf32>
    %c0_6 = arith.constant 0 : index
    %c0_7 = arith.constant 0 : index
    %7 = vector.load %arg5[%c0_6, %c0_7] : memref<8x1xf32, #tpu.memory_space<vmem>>, vector<8x1xf32>
    %8 = vector.broadcast %7 : vector<8x1xf32> to vector<8x256xf32>
    %9 = arith.addf %6, %8 : vector<8x256xf32>
    %cst_8 = arith.constant 0.000000e+00 : f32
    %10 = vector.broadcast %cst_8 : f32 to vector<8x256xf32>
    %11 = arith.maximumf %9, %10 : vector<8x256xf32>
    %c0_9 = arith.constant 0 : index
    %c0_10 = arith.constant 0 : index
    %c0_11 = arith.constant 0 : index
    %12 = vector.load %arg6[%c0_9, %c0_10, %c0_11] : memref<1x8x256xf32, #tpu.memory_space<vmem>>, vector<1x8x256xf32>
    %13 = vector.shape_cast %12 : vector<1x8x256xf32> to vector<8x256xf32>
    %14 = vector.shape_cast %11 : vector<8x256xf32> to vector<1x8x256xf32>
    tpu.vector_store %arg6[%c0_9, %c0_10, %c0_11], %14 {strides = array<i32>} : memref<1x8x256xf32, #tpu.memory_space<vmem>>, vector<1x8x256xf32>,
    return
  }
  func.func @transform_0(%arg0: i32, %arg1: i32) -> (i32, i32, i32) {
    %c0_i32 = arith.constant 0 : i32
    %c0_i32_0 = arith.constant 0 : i32
    return %arg0, %c0_i32, %arg1 : i32, i32, i32
  }
  func.func @transform_1(%arg0: i32, %arg1: i32) -> (i32, i32) {
    %c0_i32 = arith.constant 0 : i32
    %c0_i32_0 = arith.constant 0 : i32
    %c0_i32_1 = arith.constant 0 : i32
    return %c0_i32, %c0_i32_0 : i32, i32
  }
  func.func @transform_2(%arg0: i32, %arg1: i32) -> (i32, i32) {
    %c0_i32 = arith.constant 0 : i32
    %c0_i32_0 = arith.constant 0 : i32
    %c0_i32_1 = arith.constant 0 : i32
    return %c0_i32, %c0_i32_0 : i32, i32
  }
  func.func @transform_3(%arg0: i32, %arg1: i32) -> (i32, i32) {
    %c0_i32 = arith.constant 0 : i32
    %c0_i32_0 = arith.constant 0 : i32
    %c0_i32_1 = arith.constant 0 : i32
    return %c0_i32, %c0_i32_0 : i32, i32
  }
  func.func @transform_4(%arg0: i32, %arg1: i32) -> (i32, i32, i32) {
    %c0_i32 = arith.constant 0 : i32
    %c0_i32_0 = arith.constant 0 : i32
    return %arg0, %c0_i32, %arg1 : i32, i32, i32
  }
}

</mosaic_0001>

<bundles_post_ra>
// kernel: down_forward.1
= control target key start
LH: loop header
LB: loop body
LE: loop exit
PB: predicated region body
PF: predicated region fallthrough
CT: control target
= control target key end

     0   :  { %s531_s15 = smov 0   ;;  %s533_s16 = smov 0   ;;  %s577_s0 = inlined_call_operand.vmem [shape: bf16[2,48,256], index: 0, kind: input, shape index: {}]   ;;  %s578_s1 = inlined_call_operand.vmem [shape: bf16[8,48], index: 1, kind: input, shape index: {}]   ;;  %s579_s2 = inlined_call_operand.vmem [shape: f32[8,1], index: 2, kind: input, shape index: {}]   ;;  %s580_s3 = inlined_call_operand.vmem [shape: f32[8,1], index: 3, kind: input, shape index: {}]   ;;  %s581_s4 = inlined_call_operand.vmem [shape: f32[2,8,256], index: 4, kind: output, shape index: {}]  }
   0x1   :  { %s535_s17 = smov 0  }
   0x2 LB: > { %s26_s18 = sadd.s32 1, %s499_s16  ;;  %p431_p0 = scmp.ge.s32.totalorder %s503_s17, 1  ;;  %s503_s17 = sphi %s535_s17, %s14_s17   ;;  %s499_s16 = sphi %s533_s16, %s583_s16   ;;  %s495_s15 = sphi %s531_s15, %s582_s15  }
   0x3   : > { %p28_p1 = scmp.ge.s32.totalorder %s26_s18, 2  ;;  %p183_p2 = scmp.lt.s32.totalorder %s503_s17, 3 }
   0x5   : > { %s585_s18 = smov (%p28_p1, %s26_s18), 0  ;;  %p184_p3 = pnand %p431_p0, %p183_p2 }
   0x6   : > { %p218_p4 = scmp.lt.s32.totalorder (!%p184_p3), %s495_s15, 1 }
   0x7   : > { %187 = sbr.rel (%p184_p3) target bundleno = 231 (0xe7), region = 36 }
   0xc   : > { %v320_v0 = vld [vmem:[%s579_s2] sm:$0xff]  ;;  %v505_v1 = vmov 0   ;;  %s587_s15 = smov (!%p218_p4, %s495_s15), 1  ;;  %vm275_vm0 = vcmask 392192  }
   0xd   : > { %311 = vmatprep.mubr.bf16.mxu0 %v505_v1  ;;  %471 = vset.pattern.permute.xlu0 %v505_v1  ;;  %v328_v2 = vld [vmem:[%s580_s3] sm:$0xff]  ;;  %s445_s23 = smul.u32 48, %s587_s15  ;;  %s444_s29 = sshll.u32 %s587_s15, 4 }
   0xe   : > { %323 = vperm.xlu0 %471, %v320_v0   ;;  %v238_v9 = vld [vmem:[%s578_s1] sm:$0xf]  ;;  %s235_s6 = scalar_lea.vmem %s581_s4, %s444_s29 }
   0xf   : > { %s225_s26 = scalar_lea.vmem %s577_s0, %s445_s23 }
  0x10   : > { %v472_v3 = vld [vmem:[%s225_s26 + $0x24] ss:$8 sps:$4 sm:$0xff]   ;;  %v474_v4 = vld [vmem:[%s225_s26 + $0x20] ss:$8 sps:$4 sm:$0xff]   ;;  %v475_v5 = vld [vmem:[%s225_s26 + $0x14] ss:$8 sps:$4 sm:$0xff]  }
  0x11   : > { %289 = vmatprep.subr.bf16.mxu0 %v472_v3  ;;  %v477_v6 = vld [vmem:[%s225_s26 + $0x10] ss:$8 sps:$4 sm:$0xff]   ;;  %v478_v7 = vld [vmem:[%s225_s26 + $0x4] ss:$8 sps:$4 sm:$0xff]   ;;  %v480_v8 = vld [vmem:[%s225_s26] ss:$8 sps:$4 sm:$0xff]  }
  0x12   : > { %331 = vperm.xlu0 %471, %v328_v2   ;;  %290 = vmatpush1.bf16.msra.mxu0 %v474_v4 }
  0x13   : > { %291 = vmatprep.subr.bf16.mxu0 %v475_v5 }
  0x16   : > { %292 = vmatpush1.bf16.msra.mxu0 %v477_v6 }
  0x17   : > { %293 = vmatprep.subr.bf16.mxu0 %v478_v7 }
  0x1a   : > { %294 = vmatpush1.bf16.msra.mxu0 %v480_v8 }
  0x1d   : > { %441 = vmatmul.mubr.msk.bf16.vlgmr.msra.gmra.mxu0 %vm275_vm0, %v238_v9 }
  0x89   : > { %v324_v10 = vpop.permute.xlu0 %323 }
  0x8d   : > { %v332_v13 = vpop.permute.xlu0 %331 }
  0xdd   : > { %v313_v11 = vpop.f32.mrf.mxu0 }
  0xde   : > { %v326_v12 = vmul.f32 %v324_v10, %v313_v11 }
  0xdf   : > { %v315_v14 = vpop.f32.mrf.mxu0 }
  0xe0   : > { %v334_v15 = vadd.f32 %v332_v13, %v326_v12  ;;  %v327_v16 = vmul.f32 %v324_v10, %v315_v14 }
  0xe1   : > { %v317_v17 = vpop.f32.mrf.mxu0 }
  0xe2   : > { %v336_v18 = vmax.f32 %v334_v15, 0.0  ;;  %v335_v19 = vadd.f32 %v332_v13, %v327_v16 }
  0xe3   : > { %v318_v20 = vpop.f32.mrf.mxu0 }
  0xe4   : > { %338 = vst [vmem:[%s235_s6] sm:$0xff] %v336_v18  ;;  %v337_v21 = vmax.f32 %v335_v19, 0.0 }
  0xe6   : > { %339 = vst [vmem:[%s235_s6 + $0x8] sm:$0xff] %v337_v21 }
  0xe7 PF: > { %s14_s17 = sadd.s32 1, %s503_s17   ;;  %s582_s15 = smov %s499_s16 }
  0xe8   : > { %p11_p5 = scmp.ge.s32.totalorder %s14_s17, 4   ;;  %s583_s16 = smov %s585_s18 }
  0xea   :  { %13 = sbr.rel (!%p11_p5) target bundleno = 2 (0x2), region = 66 }

</bundles_post_ra>
